<compile_context>
chip_gen: v7x
topology: tpu7x:2x2x1
jax: 0.10.0
libtpu: 0.0.40
codegen_flags: <defaults>
</compile_context>

<pallas_src>
import math

import jax
import jax.numpy as jnp
from jax.experimental import pallas as pl
from jax.experimental.pallas import tpu as pltpu


def _round_up(v, m):
    return ((v + m - 1) // m) * m


def _sigmoid(v):
    return 1.0 / (1.0 + jnp.exp(-v))


def _make_kernel(activation):
    """Builds the fused GRUCell + EqualLinear kernel for one batch tile.

    Ref layout:
      x_ref : (TB, D)    current w input tile
      h_ref : (TB, H)    previous style hidden tile
      wx_ref: (3, D, H)  stacked [W_ir^T, W_iz^T, W_in^T]
      wh_ref: (3, H, H)  stacked [W_hr^T, W_hz^T, W_hn^T]
      b_ref : (4, H)     [b_ir + b_hr, b_iz + b_hz, b_in, b_hn]
      wa_ref: (H, S)     affine weight, pre-scaled and transposed
      ba_ref: (1, S)     affine bias * lr_mul
    """

    def kernel(x_ref, h_ref, wx_ref, wh_ref, b_ref, wa_ref, ba_ref,
               h2_ref, s2_ref):
        f32 = jnp.float32
        x = x_ref[...]
        h = h_ref[...]

        xr = jnp.dot(x, wx_ref[0], preferred_element_type=f32)
        xz = jnp.dot(x, wx_ref[1], preferred_element_type=f32)
        xn = jnp.dot(x, wx_ref[2], preferred_element_type=f32)
        hr = jnp.dot(h, wh_ref[0], preferred_element_type=f32)
        hz = jnp.dot(h, wh_ref[1], preferred_element_type=f32)
        hn = jnp.dot(h, wh_ref[2], preferred_element_type=f32)

        b_r = b_ref[0:1, :]
        b_z = b_ref[1:2, :]
        b_in = b_ref[2:3, :]
        b_hn = b_ref[3:4, :]

        r = _sigmoid(xr + hr + b_r)
        z = _sigmoid(xz + hz + b_z)
        n = jnp.tanh(xn + b_in + r * (hn + b_hn))
        h2 = (1.0 - z) * n + z * h

        # EqualLinear: pre-activation is identical across all activation modes
        # (weight pre-scaled by 1/sqrt(H)*lr_mul, bias pre-scaled by lr_mul).
        s2 = jnp.dot(h2, wa_ref[...], preferred_element_type=f32) + ba_ref[...]

        if activation is None:
            pass
        elif activation == "tanh":
            s2 = jnp.tanh(s2)
        elif activation == "fused_lrelu":
            # fused_leaky_relu(x, bias): leaky_relu(x + bias, 0.2) * sqrt(2)
            s2 = jnp.where(s2 >= 0.0, s2, 0.2 * s2) * math.sqrt(2.0)
        elif activation == "sqrt_softmax":
            m = jnp.max(s2, axis=-1, keepdims=True)
            e = jnp.exp(s2 - m)
            s2 = jnp.sqrt(e * pl.reciprocal(jnp.sum(e, axis=-1, keepdims=True),
                                            approx=False))
        else:
            raise ValueError(f"unknown activation: {activation!r}")

        h2_ref[...] = h2.astype(h2_ref.dtype)
        s2_ref[...] = s2.astype(s2_ref.dtype)

    return kernel


def gru_map_with_prev_style(h1, w2, params, activation=None, batch_tile=512):
    """Forward of GRU_map_with_prev_style. Returns (h2, s2)."""
    weight_ih = params["gru_weight_ih"]     # (3H, D)
    weight_hh = params["gru_weight_hh"]     # (3H, H)
    bias_ih = params["gru_bias_ih"]         # (3H,)
    bias_hh = params["gru_bias_hh"]         # (3H,)
    aw = params["affine_weight"]            # (S, H)
    ab = params["affine_bias"]              # (S,)
    lr_mul = float(params.get("affine_lr_mul", 1.0))

    B, D = w2.shape
    H = weight_hh.shape[1]
    S = aw.shape[0]
    assert h1.shape == (B, H)
    assert weight_ih.shape == (3 * H, D)
    assert weight_hh.shape == (3 * H, H)

    f32 = jnp.float32
    # Constant-folded parameter glue (done once, outside the kernel).
    wx = jnp.stack([weight_ih[0:H].T,
                    weight_ih[H:2 * H].T,
                    weight_ih[2 * H:3 * H].T]).astype(f32)          # (3, D, H)
    wh = jnp.stack([weight_hh[0:H].T,
                    weight_hh[H:2 * H].T,
                    weight_hh[2 * H:3 * H].T]).astype(f32)          # (3, H, H)
    b = jnp.stack([bias_ih[0:H] + bias_hh[0:H],
                   bias_ih[H:2 * H] + bias_hh[H:2 * H],
                   bias_ih[2 * H:3 * H],
                   bias_hh[2 * H:3 * H]]).astype(f32)               # (4, H)
    scale = (1.0 / math.sqrt(H)) * lr_mul
    wa = (aw.astype(f32) * scale).T                                 # (H, S)
    ba = (ab.astype(f32) * lr_mul)[None, :]                         # (1, S)

    # Batch tiling: round the tile up to a sublane multiple of 8, cap its size.
    tb = min(_round_up(B, 8), batch_tile)
    bp = _round_up(B, tb)
    xf = w2.astype(f32)
    hf = h1.astype(f32)
    if bp != B:
        xf = jnp.pad(xf, ((0, bp - B), (0, 0)))
        hf = jnp.pad(hf, ((0, bp - B), (0, 0)))

    h2, s2 = pl.pallas_call(
        _make_kernel(activation),
        out_shape=(jax.ShapeDtypeStruct((bp, H), f32),
                   jax.ShapeDtypeStruct((bp, S), f32)),
        grid=(bp // tb,),
        in_specs=[
            pl.BlockSpec((tb, D), lambda i: (i, 0)),        # w2 tile
            pl.BlockSpec((tb, H), lambda i: (i, 0)),        # h1 tile
            pl.BlockSpec((3, D, H), lambda i: (0, 0, 0)),   # input-gate weights
            pl.BlockSpec((3, H, H), lambda i: (0, 0, 0)),   # hidden-gate weights
            pl.BlockSpec((4, H), lambda i: (0, 0)),         # fused gate biases
            pl.BlockSpec((H, S), lambda i: (0, 0)),         # affine weight
            pl.BlockSpec((1, S), lambda i: (0, 0)),         # affine bias
        ],
        out_specs=(
            pl.BlockSpec((tb, H), lambda i: (i, 0)),
            pl.BlockSpec((tb, S), lambda i: (i, 0)),
        ),
        compiler_params=pltpu.CompilerParams(
            dimension_semantics=("parallel",)),
    )(xf, hf, wx, wh, b, wa, ba)

    return h2[:B], s2[:B]


def _reference(h1, w2, params, activation=None):
    """Pure-JAX reference matching torch.nn.GRUCell + EqualLinear."""
    weight_ih = params["gru_weight_ih"]
    weight_hh = params["gru_weight_hh"]
    bias_ih = params["gru_bias_ih"]
    bias_hh = params["gru_bias_hh"]
    aw = params["affine_weight"]
    ab = params["affine_bias"]
    lr_mul = float(params.get("affine_lr_mul", 1.0))
    H = weight_hh.shape[1]
    hi = jax.lax.Precision.HIGHEST

    gi = jnp.dot(w2, weight_ih.T, precision=hi) + bias_ih
    gh = jnp.dot(h1, weight_hh.T, precision=hi) + bias_hh
    i_r, i_z, i_n = gi[:, :H], gi[:, H:2 * H], gi[:, 2 * H:]
    h_r, h_z, h_n = gh[:, :H], gh[:, H:2 * H], gh[:, 2 * H:]
    r = _sigmoid(i_r + h_r)
    z = _sigmoid(i_z + h_z)
    n = jnp.tanh(i_n + r * h_n)
    h2 = (1.0 - z) * n + z * h1
    scale = (1.0 / math.sqrt(H)) * lr_mul
    s2 = jnp.dot(h2, (aw * scale).T, precision=hi) + ab * lr_mul
    if activation is None:
        pass
    elif activation == "tanh":
        s2 = jnp.tanh(s2)
    elif activation == "fused_lrelu":
        s2 = jnp.where(s2 >= 0.0, s2, 0.2 * s2) * math.sqrt(2.0)
    elif activation == "sqrt_softmax":
        s2 = jnp.sqrt(jax.nn.softmax(s2, axis=1))
    return h2, s2


if __name__ == "__main__":
    key = jax.random.PRNGKey(0)
    B, D, H, S = 2, 32, 32, 32   # batch, w-in dim, prev-style hidden, out-style
    ks = jax.random.split(key, 8)
    params = {
        "gru_weight_ih": jax.random.normal(ks[0], (3 * H, D), jnp.float32) * 0.1,
        "gru_weight_hh": jax.random.normal(ks[1], (3 * H, H), jnp.float32) * 0.1,
        "gru_bias_ih": jax.random.normal(ks[2], (3 * H,), jnp.float32) * 0.1,
        "gru_bias_hh": jax.random.normal(ks[3], (3 * H,), jnp.float32) * 0.1,
        "affine_weight": jax.random.normal(ks[4], (S, H), jnp.float32),
        "affine_bias": jax.random.normal(ks[5], (S,), jnp.float32) * 0.1,
        "affine_lr_mul": 1.0,
    }
    h1 = jax.random.normal(ks[6], (B, H), jnp.float32)
    w2 = jax.random.normal(ks[7], (B, D), jnp.float32)

    ok = True
    # Default module config (final_activation=None).
    h2, s2 = gru_map_with_prev_style(h1, w2, params, activation=None)
    h2 = jax.block_until_ready(h2)
    s2 = jax.block_until_ready(s2)
    h2_ref, s2_ref = _reference(h1, w2, params, activation=None)
    assert h2.shape == (B, H) and s2.shape == (B, S), (h2.shape, s2.shape)
    assert jnp.allclose(h2, h2_ref, atol=5e-4, rtol=5e-4), (
        float(jnp.max(jnp.abs(h2 - h2_ref))))
    assert jnp.allclose(s2, s2_ref, atol=5e-4, rtol=5e-4), (
        float(jnp.max(jnp.abs(s2 - s2_ref))))

    # Also exercise the other EqualLinear final activations from the spec.
    for act in ("tanh", "fused_lrelu", "sqrt_softmax"):
        h2a, s2a = gru_map_with_prev_style(h1, w2, params, activation=act)
        s2a = jax.block_until_ready(s2a)
        h2r, s2r = _reference(h1, w2, params, activation=act)
        assert jnp.allclose(h2a, h2r, atol=5e-4, rtol=5e-4), act
        assert jnp.allclose(s2a, s2r, atol=5e-4, rtol=5e-4), (
            act, float(jnp.max(jnp.abs(s2a - s2r))))

    if ok:
        print("KERNEL_OK")
</pallas_src>

<mosaic_0001>
module attributes {stable_mosaic.version = 11 : i64} {
  func.func @kernel(%arg0: i32, %arg1: memref<8x32xf32, #tpu.memory_space<vmem>>, %arg2: memref<8x32xf32, #tpu.memory_space<vmem>>, %arg3: memref<3x32x32xf32, #tpu.memory_space<vmem>>, %arg4: memref<3x32x32xf32, #tpu.memory_space<vmem>>, %arg5: memref<4x32xf32, #tpu.memory_space<vmem>>, %arg6: memref<32x32xf32, #tpu.memory_space<vmem>>, %arg7: memref<1x32xf32, #tpu.memory_space<vmem>>, %arg8: memref<8x32xf32, #tpu.memory_space<vmem>>, %arg9: memref<8x32xf32, #tpu.memory_space<vmem>>) attributes {dimension_semantics = [#tpu.dimension_semantics<parallel>], iteration_bounds = array<i64: 1>, scalar_prefetch = 0 : i64, scratch_operands = 0 : i64, tpu.core_type = #tpu.core_type<tc>, window_params = [{transform_indices = @transform_0, window_bounds = array<i64: 8, 32>}, {transform_indices = @transform_1, window_bounds = array<i64: 8, 32>}, {pipeline_mode = #tpu.pipeline_mode<synchronous>, transform_indices = @transform_2, window_bounds = array<i64: 3, 32, 32>}, {pipeline_mode = #tpu.pipeline_mode<synchronous>, transform_indices = @transform_3, window_bounds = array<i64: 3, 32, 32>}, {pipeline_mode = #tpu.pipeline_mode<synchronous>, transform_indices = @transform_4, window_bounds = array<i64: 4, 32>}, {pipeline_mode = #tpu.pipeline_mode<synchronous>, transform_indices = @transform_5, window_bounds = array<i64: 32, 32>}, {pipeline_mode = #tpu.pipeline_mode<synchronous>, transform_indices = @transform_6, window_bounds = array<i64: 1, 32>}, {transform_indices = @transform_7, window_bounds = array<i64: 8, 32>}, {transform_indices = @transform_8, window_bounds = array<i64: 8, 32>}]} {
    %c0 = arith.constant 0 : index
    %c0_0 = arith.constant 0 : index
    %0 = vector.load %arg1[%c0, %c0_0] : memref<8x32xf32, #tpu.memory_space<vmem>>, vector<8x32xf32>
    %c0_1 = arith.constant 0 : index
    %c0_2 = arith.constant 0 : index
    %1 = vector.load %arg2[%c0_1, %c0_2] : memref<8x32xf32, #tpu.memory_space<vmem>>, vector<8x32xf32>
    %c0_3 = arith.constant 0 : index
    %c0_4 = arith.constant 0 : index
    %c0_5 = arith.constant 0 : index
    %2 = vector.load %arg3[%c0_3, %c0_4, %c0_5] : memref<3x32x32xf32, #tpu.memory_space<vmem>>, vector<1x32x32xf32>
    %3 = vector.shape_cast %2 : vector<1x32x32xf32> to vector<32x32xf32>
    %cst = arith.constant dense<0.000000e+00> : vector<8x32xf32>
    %4 = tpu.matmul %0, %3, %cst {dimension_numbers = #tpu.dot_dimension_numbers<[1], [0], [0], [1], [0, 0, 1, 1], [], []>} : vector<8x32xf32>, vector<32x32xf32>, vector<8x32xf32> -> vector<8x32xf32>
    %c1 = arith.constant 1 : index
    %c0_6 = arith.constant 0 : index
    %c0_7 = arith.constant 0 : index
    %5 = vector.load %arg3[%c1, %c0_6, %c0_7] : memref<3x32x32xf32, #tpu.memory_space<vmem>>, vector<1x32x32xf32>
    %6 = vector.shape_cast %5 : vector<1x32x32xf32> to vector<32x32xf32>
    %cst_8 = arith.constant dense<0.000000e+00> : vector<8x32xf32>
    %7 = tpu.matmul %0, %6, %cst_8 {dimension_numbers = #tpu.dot_dimension_numbers<[1], [0], [0], [1], [0, 0, 1, 1], [], []>} : vector<8x32xf32>, vector<32x32xf32>, vector<8x32xf32> -> vector<8x32xf32>
    %c2 = arith.constant 2 : index
    %c0_9 = arith.constant 0 : index
    %c0_10 = arith.constant 0 : index
    %8 = vector.load %arg3[%c2, %c0_9, %c0_10] : memref<3x32x32xf32, #tpu.memory_space<vmem>>, vector<1x32x32xf32>
    %9 = vector.shape_cast %8 : vector<1x32x32xf32> to vector<32x32xf32>
    %cst_11 = arith.constant dense<0.000000e+00> : vector<8x32xf32>
    %10 = tpu.matmul %0, %9, %cst_11 {dimension_numbers = #tpu.dot_dimension_numbers<[1], [0], [0], [1], [0, 0, 1, 1], [], []>} : vector<8x32xf32>, vector<32x32xf32>, vector<8x32xf32> -> vector<8x32xf32>
    %c0_12 = arith.constant 0 : index
    %c0_13 = arith.constant 0 : index
    %c0_14 = arith.constant 0 : index
    %11 = vector.load %arg4[%c0_12, %c0_13, %c0_14] : memref<3x32x32xf32, #tpu.memory_space<vmem>>, vector<1x32x32xf32>
    %12 = vector.shape_cast %11 : vector<1x32x32xf32> to vector<32x32xf32>
    %cst_15 = arith.constant dense<0.000000e+00> : vector<8x32xf32>
    %13 = tpu.matmul %1, %12, %cst_15 {dimension_numbers = #tpu.dot_dimension_numbers<[1], [0], [0], [1], [0, 0, 1, 1], [], []>} : vector<8x32xf32>, vector<32x32xf32>, vector<8x32xf32> -> vector<8x32xf32>
    %c1_16 = arith.constant 1 : index
    %c0_17 = arith.constant 0 : index
    %c0_18 = arith.constant 0 : index
    %14 = vector.load %arg4[%c1_16, %c0_17, %c0_18] : memref<3x32x32xf32, #tpu.memory_space<vmem>>, vector<1x32x32xf32>
    %15 = vector.shape_cast %14 : vector<1x32x32xf32> to vector<32x32xf32>
    %cst_19 = arith.constant dense<0.000000e+00> : vector<8x32xf32>
    %16 = tpu.matmul %1, %15, %cst_19 {dimension_numbers = #tpu.dot_dimension_numbers<[1], [0], [0], [1], [0, 0, 1, 1], [], []>} : vector<8x32xf32>, vector<32x32xf32>, vector<8x32xf32> -> vector<8x32xf32>
    %c2_20 = arith.constant 2 : index
    %c0_21 = arith.constant 0 : index
    %c0_22 = arith.constant 0 : index
    %17 = vector.load %arg4[%c2_20, %c0_21, %c0_22] : memref<3x32x32xf32, #tpu.memory_space<vmem>>, vector<1x32x32xf32>
    %18 = vector.shape_cast %17 : vector<1x32x32xf32> to vector<32x32xf32>
    %cst_23 = arith.constant dense<0.000000e+00> : vector<8x32xf32>
    %19 = tpu.matmul %1, %18, %cst_23 {dimension_numbers = #tpu.dot_dimension_numbers<[1], [0], [0], [1], [0, 0, 1, 1], [], []>} : vector<8x32xf32>, vector<32x32xf32>, vector<8x32xf32> -> vector<8x32xf32>
    %c0_24 = arith.constant 0 : index
    %c0_25 = arith.constant 0 : index
    %20 = vector.load %arg5[%c0_24, %c0_25] : memref<4x32xf32, #tpu.memory_space<vmem>>, vector<1x32xf32>
    %c1_26 = arith.constant 1 : index
    %c0_27 = arith.constant 0 : index
    %21 = vector.load %arg5[%c1_26, %c0_27] : memref<4x32xf32, #tpu.memory_space<vmem>>, vector<1x32xf32>
    %c2_28 = arith.constant 2 : index
    %c0_29 = arith.constant 0 : index
    %22 = vector.load %arg5[%c2_28, %c0_29] : memref<4x32xf32, #tpu.memory_space<vmem>>, vector<1x32xf32>
    %c3 = arith.constant 3 : index
    %c0_30 = arith.constant 0 : index
    %23 = vector.load %arg5[%c3, %c0_30] : memref<4x32xf32, #tpu.memory_space<vmem>>, vector<1x32xf32>
    %24 = arith.addf %4, %13 : vector<8x32xf32>
    %25 = vector.broadcast %20 : vector<1x32xf32> to vector<8x32xf32>
    %26 = arith.addf %24, %25 : vector<8x32xf32>
    %cst_31 = arith.constant 0.000000e+00 : f32
    %27 = vector.broadcast %cst_31 : f32 to vector<8x32xf32>
    %28 = arith.subf %27, %26 : vector<8x32xf32>
    %29 = math.exp %28 : vector<8x32xf32>
    %cst_32 = arith.constant 1.000000e+00 : f32
    %30 = vector.broadcast %cst_32 : f32 to vector<8x32xf32>
    %31 = arith.addf %30, %29 : vector<8x32xf32>
    %cst_33 = arith.constant 1.000000e+00 : f32
    %32 = vector.broadcast %cst_33 : f32 to vector<8x32xf32>
    %33 = arith.divf %32, %31 : vector<8x32xf32>
    %34 = arith.addf %7, %16 : vector<8x32xf32>
    %35 = vector.broadcast %21 : vector<1x32xf32> to vector<8x32xf32>
    %36 = arith.addf %34, %35 : vector<8x32xf32>
    %cst_34 = arith.constant 0.000000e+00 : f32
    %37 = vector.broadcast %cst_34 : f32 to vector<8x32xf32>
    %38 = arith.subf %37, %36 : vector<8x32xf32>
    %39 = math.exp %38 : vector<8x32xf32>
    %cst_35 = arith.constant 1.000000e+00 : f32
    %40 = vector.broadcast %cst_35 : f32 to vector<8x32xf32>
    %41 = arith.addf %40, %39 : vector<8x32xf32>
    %cst_36 = arith.constant 1.000000e+00 : f32
    %42 = vector.broadcast %cst_36 : f32 to vector<8x32xf32>
    %43 = arith.divf %42, %41 : vector<8x32xf32>
    %44 = vector.broadcast %22 : vector<1x32xf32> to vector<8x32xf32>
    %45 = arith.addf %10, %44 : vector<8x32xf32>
    %46 = vector.broadcast %23 : vector<1x32xf32> to vector<8x32xf32>
    %47 = arith.addf %19, %46 : vector<8x32xf32>
    %48 = arith.mulf %33, %47 : vector<8x32xf32>
    %49 = arith.addf %45, %48 : vector<8x32xf32>
    %50 = math.tanh %49 : vector<8x32xf32>
    %cst_37 = arith.constant 1.000000e+00 : f32
    %51 = vector.broadcast %cst_37 : f32 to vector<8x32xf32>
    %52 = arith.subf %51, %43 : vector<8x32xf32>
    %53 = arith.mulf %52, %50 : vector<8x32xf32>
    %54 = arith.mulf %43, %1 : vector<8x32xf32>
    %55 = arith.addf %53, %54 : vector<8x32xf32>
    %c0_38 = arith.constant 0 : index
    %c0_39 = arith.constant 0 : index
    %56 = vector.load %arg6[%c0_38, %c0_39] : memref<32x32xf32, #tpu.memory_space<vmem>>, vector<32x32xf32>
    %cst_40 = arith.constant dense<0.000000e+00> : vector<8x32xf32>
    %57 = tpu.matmul %55, %56, %cst_40 {dimension_numbers = #tpu.dot_dimension_numbers<[1], [0], [0], [1], [0, 0, 1, 1], [], []>} : vector<8x32xf32>, vector<32x32xf32>, vector<8x32xf32> -> vector<8x32xf32>
    %c0_41 = arith.constant 0 : index
    %c0_42 = arith.constant 0 : index
    %58 = vector.load %arg7[%c0_41, %c0_42] : memref<1x32xf32, #tpu.memory_space<vmem>>, vector<1x32xf32>
    %59 = vector.broadcast %58 : vector<1x32xf32> to vector<8x32xf32>
    %60 = arith.addf %57, %59 : vector<8x32xf32>
    %c0_43 = arith.constant 0 : index
    %c0_44 = arith.constant 0 : index
    %61 = vector.load %arg8[%c0_43, %c0_44] : memref<8x32xf32, #tpu.memory_space<vmem>>, vector<8x32xf32>
    tpu.vector_store %arg8[%c0_43, %c0_44], %55 {strides = array<i32>} : memref<8x32xf32, #tpu.memory_space<vmem>>, vector<8x32xf32>,
    %c0_45 = arith.constant 0 : index
    %c0_46 = arith.constant 0 : index
    %62 = vector.load %arg9[%c0_45, %c0_46] : memref<8x32xf32, #tpu.memory_space<vmem>>, vector<8x32xf32>
    tpu.vector_store %arg9[%c0_45, %c0_46], %60 {strides = array<i32>} : memref<8x32xf32, #tpu.memory_space<vmem>>, vector<8x32xf32>,
    return
  }
  func.func @transform_0(%arg0: i32) -> (i32, i32) {
    %c0_i32 = arith.constant 0 : i32
    %c0_i32_0 = arith.constant 0 : i32
    return %arg0, %c0_i32 : i32, i32
  }
  func.func @transform_1(%arg0: i32) -> (i32, i32) {
    %c0_i32 = arith.constant 0 : i32
    %c0_i32_0 = arith.constant 0 : i32
    return %arg0, %c0_i32 : i32, i32
  }
  func.func @transform_2(%arg0: i32) -> (i32, i32, i32) {
    %c0_i32 = arith.constant 0 : i32
    %c0_i32_0 = arith.constant 0 : i32
    %c0_i32_1 = arith.constant 0 : i32
    %c0_i32_2 = arith.constant 0 : i32
    return %c0_i32, %c0_i32_0, %c0_i32_1 : i32, i32, i32
  }
  func.func @transform_3(%arg0: i32) -> (i32, i32, i32) {
    %c0_i32 = arith.constant 0 : i32
    %c0_i32_0 = arith.constant 0 : i32
    %c0_i32_1 = arith.constant 0 : i32
    %c0_i32_2 = arith.constant 0 : i32
    return %c0_i32, %c0_i32_0, %c0_i32_1 : i32, i32, i32
  }
  func.func @transform_4(%arg0: i32) -> (i32, i32) {
    %c0_i32 = arith.constant 0 : i32
    %c0_i32_0 = arith.constant 0 : i32
    %c0_i32_1 = arith.constant 0 : i32
    return %c0_i32, %c0_i32_0 : i32, i32
  }
  func.func @transform_5(%arg0: i32) -> (i32, i32) {
    %c0_i32 = arith.constant 0 : i32
    %c0_i32_0 = arith.constant 0 : i32
    %c0_i32_1 = arith.constant 0 : i32
    return %c0_i32, %c0_i32_0 : i32, i32
  }
  func.func @transform_6(%arg0: i32) -> (i32, i32) {
    %c0_i32 = arith.constant 0 : i32
    %c0_i32_0 = arith.constant 0 : i32
    %c0_i32_1 = arith.constant 0 : i32
    return %c0_i32, %c0_i32_0 : i32, i32
  }
  func.func @transform_7(%arg0: i32) -> (i32, i32) {
    %c0_i32 = arith.constant 0 : i32
    %c0_i32_0 = arith.constant 0 : i32
    return %arg0, %c0_i32 : i32, i32
  }
  func.func @transform_8(%arg0: i32) -> (i32, i32) {
    %c0_i32 = arith.constant 0 : i32
    %c0_i32_0 = arith.constant 0 : i32
    return %arg0, %c0_i32 : i32, i32
  }
}

</mosaic_0001>

<bundles_post_ra>
// kernel: tpu_custom_call.1
= control target key start
LH: loop header
LB: loop body
LE: loop exit
PB: predicated region body
PF: predicated region fallthrough
CT: control target
= control target key end

     0   :  { %14 = vsyncpa [#allocation3], 0  ;;  %s1269_s0 = inlined_call_operand.hbm [shape: f32[8,32], index: 0, kind: input, shape index: {}]   ;;  %s1270_s1 = inlined_call_operand.hbm [shape: f32[8,32], index: 1, kind: input, shape index: {}]   ;;  %s1271_s2 = inlined_call_operand.hbm [shape: f32[3,32,32], index: 2, kind: input, shape index: {}]   ;;  %s1272_s3 = inlined_call_operand.hbm [shape: f32[3,32,32], index: 3, kind: input, shape index: {}]   ;;  %s1273_s4 = inlined_call_operand.vmem [shape: f32[4,32], index: 4, kind: input, shape index: {}]   ;;  %s1274_s5 = inlined_call_operand.hbm [shape: f32[32,32], index: 5, kind: input, shape index: {}]   ;;  %s1275_s6 = inlined_call_operand.vmem [shape: f32[1,32], index: 6, kind: input, shape index: {}]   ;;  %s1276_s7 = inlined_call_operand.hbm [shape: f32[8,32], index: 7, kind: output, shape index: {0}]   ;;  %s1277_s8 = inlined_call_operand.hbm [shape: f32[8,32], index: 8, kind: output, shape index: {1}]  }
   0x1   :  { %15 = vsyncpa [#allocation6], 0 }
   0x2   :  { %16 = vsyncpa [#allocation9], 0 }
   0x3   :  { %17 = vsyncpa [#allocation4], 0 }
   0x4   :  { %18 = vsyncpa [#allocation13], 0  ;;  %s1061_s27 = smov [#allocation5]   ;;  %s897_s9 = scalar_lea.hbm %s1270_s1, 128 }
   0x5   :  { %s35_s28 = sshll.u32 %s1061_s27, 4  ;;  %p898_p0 = scmp.ne.s32.totalorder %s1270_s1, %s897_s9  ;;  %s36_s28 = int_to_ptr.vmem [resolvable:$true] %s35_s28 }
   0x6   :  { %p901_p1 = scmp.lt.u32.totalorder %s897_s9, %s1270_s1 }
   0x8   :  { %p903_p2 = pnand %p901_p1, %p898_p0 }
   0xa   :  { %906 = shalt.err (!%p903_p2)
}
   0xb   :  { %s907_s14 = scalar_lea.vmem %s36_s28, 128  ;;  %p912_p4 = scmp.lt.s32.totalorder %s36_s28, %s36_s28 }
   0xc   :  { %p908_p3 = scmp.ne.s32.totalorder %s36_s28, %s907_s14  ;;  %p913_p5 = scmp.lt.s32.totalorder %s907_s14, %s907_s14 }
   0xe   :  { %p914_p6 = por %p913_p5, %p912_p4 }
  0x10   :  { %p915_p7 = pnand %p914_p6, %p908_p3 }
  0x12   :  { %918 = shalt.err (!%p915_p7)
}
  0x13   :  { %38 = dma.hbm_to_vmem [thread:$0]  %s1270_s1, 128, %s36_s28, [#allocation6]  }
  0x14   :  { %s1062_s17 = smov [#allocation8]   ;;  %s1063_s19 = smov [#allocation2]  }
  0x15   :  { %s56_s18 = sshll.u32 %s1062_s17, 4  ;;  %s25_s20 = sshll.u32 %s1063_s19, 4  ;;  %s57_s18 = int_to_ptr.vmem [resolvable:$true] %s56_s18  ;;  %s26_s20 = int_to_ptr.vmem [resolvable:$true] %s25_s20 }
  0x16   :  { %s919_s23 = scalar_lea.hbm %s1272_s3, 1536 }
  0x17   :  { %p920_p8 = scmp.ne.s32.totalorder %s1272_s3, %s919_s23  ;;  %p923_p9 = scmp.lt.u32.totalorder %s919_s23, %s1272_s3 }
  0x19   :  { %p925_p10 = pnand %p923_p9, %p920_p8 }
  0x1b   :  { %928 = shalt.err (!%p925_p10)
}
  0x1c   :  { %s929_s1 = scalar_lea.vmem %s57_s18, 1536  ;;  %p934_p12 = scmp.lt.s32.totalorder %s57_s18, %s57_s18 }
  0x1d   :  { %p930_p11 = scmp.ne.s32.totalorder %s57_s18, %s929_s1  ;;  %p935_p13 = scmp.lt.s32.totalorder %s929_s1, %s929_s1 }
  0x1f   :  { %p936_p0 = por %p935_p13, %p934_p12 }
  0x21   :  { %p937_p1 = pnand %p936_p0, %p930_p11 }
  0x23   :  { %940 = shalt.err (!%p937_p1)
}
  0x24   :  { %s1064_s28 = smov 128   ;;  %s1065_s29 = smov 8  }
  0x25   :  { %62 = dma.hbm_to_vmem [thread:$0]  %s1272_s3, 1536, %s57_s18, [#allocation9], %s1064_s28, %s1064_s28, %s1065_s29  }
  0x26   :  { %s941_s12 = scalar_lea.hbm %s1269_s0, 128 }
  0x27   :  { %p942_p2 = scmp.ne.s32.totalorder %s1269_s0, %s941_s12  ;;  %p945_p3 = scmp.lt.u32.totalorder %s941_s12, %s1269_s0 }
  0x29   :  { %p947_p4 = pnand %p945_p3, %p942_p2 }
  0x2b   :  { %950 = shalt.err (!%p947_p4)
}
  0x2c   :  { %s951_s17 = scalar_lea.vmem %s26_s20, 128  ;;  %p956_p6 = scmp.lt.s32.totalorder %s26_s20, %s26_s20 }
  0x2d   :  { %p952_p5 = scmp.ne.s32.totalorder %s26_s20, %s951_s17  ;;  %p957_p7 = scmp.lt.s32.totalorder %s951_s17, %s951_s17 }
  0x2f   :  { %p958_p8 = por %p957_p7, %p956_p6 }
  0x31   :  { %p959_p9 = pnand %p958_p8, %p952_p5 }
  0x33   :  { %962 = shalt.err (!%p959_p9)
}
  0x34   :  { %28 = dma.hbm_to_vmem [thread:$0]  %s1269_s0, 128, %s26_s20, [#allocation3]  }
  0x35   :  { %s1066_s19 = smov [#allocation7]   ;;  %s1067_s22 = smov [#allocation10]  }
  0x36   :  { %s44_s21 = sshll.u32 %s1066_s19, 4  ;;  %s70_s23 = sshll.u32 %s1067_s22, 4  ;;  %s45_s21 = int_to_ptr.vmem [resolvable:$true] %s44_s21  ;;  %s71_s23 = int_to_ptr.vmem [resolvable:$true] %s70_s23 }
  0x37   :  { %s963_s26 = scalar_lea.hbm %s1271_s2, 1536 }
  0x38   :  { %p964_p10 = scmp.ne.s32.totalorder %s1271_s2, %s963_s26  ;;  %p967_p11 = scmp.lt.u32.totalorder %s963_s26, %s1271_s2 }
  0x3a   :  { %p969_p12 = pnand %p967_p11, %p964_p10 }
  0x3c   :  { %972 = shalt.err (!%p969_p12)
}
  0x3d   :  { %s973_s0 = scalar_lea.vmem %s45_s21, 1536  ;;  %p978_p0 = scmp.lt.s32.totalorder %s45_s21, %s45_s21 }
  0x3e   :  { %p974_p13 = scmp.ne.s32.totalorder %s45_s21, %s973_s0  ;;  %p979_p1 = scmp.lt.s32.totalorder %s973_s0, %s973_s0 }
  0x40   :  { %p980_p2 = por %p979_p1, %p978_p0 }
  0x42   :  { %p981_p3 = pnand %p980_p2, %p974_p13 }
  0x44   :  { %984 = shalt.err (!%p981_p3)
}
  0x45   :  { %50 = dma.hbm_to_vmem [thread:$0]  %s1271_s2, 1536, %s45_s21, [#allocation6], %s1064_s28, %s1064_s28, %s1065_s29  }
  0x46   :  { %s985_s13 = scalar_lea.hbm %s1274_s5, 512 }
  0x47   :  { %p986_p4 = scmp.ne.s32.totalorder %s1274_s5, %s985_s13  ;;  %p989_p5 = scmp.lt.u32.totalorder %s985_s13, %s1274_s5 }
  0x49   :  { %p991_p6 = pnand %p989_p5, %p986_p4 }
  0x4b   :  { %994 = shalt.err (!%p991_p6)
}
  0x4c   :  { %s995_s3 = scalar_lea.vmem %s71_s23, 512  ;;  %p1000_p8 = scmp.lt.s32.totalorder %s71_s23, %s71_s23 }
  0x4d   :  { %p996_p7 = scmp.ne.s32.totalorder %s71_s23, %s995_s3  ;;  %p1001_p9 = scmp.lt.s32.totalorder %s995_s3, %s995_s3 }
  0x4f   :  { %p1002_p10 = por %p1001_p9, %p1000_p8 }
  0x51   :  { %p1003_p11 = pnand %p1002_p10, %p996_p7 }
  0x53   :  { %1006 = shalt.err (!%p1003_p11)
}
  0x54   :  { %76 = dma.hbm_to_vmem [thread:$0]  %s1274_s5, 512, %s71_s23, [#allocation9], %s1064_s28, %s1064_s28, %s1065_s29  }
  0x55   :  { %1051 = dma.done.wait [#allocation3], 128  }
  0x56   :  { %1052 = vsyncadd [#allocation3], 4294967168 }
  0x57   :  { %1053 = dma.done.wait [#allocation6], 1664  }
  0x58   :  { %1054 = vsyncadd [#allocation6], 4294965632 }
  0x59   :  { %1055 = dma.done.wait [#allocation9], 2048  }
  0x5a   :  { %1056 = vsyncadd [#allocation9], 4294965248  ;;  %v1068_v0 = vmov 0.0|0.0   ;;  %vm1069_vm0 = vmmov 0   ;;  %v1070_v1 = vmov 0.0   ;;  %v110_v2 = vld [vmem:[#allocation8] sm:$0xff] }
  0x5b   :  { %833 = vmatprep.subr.bf16.mxu0 %v1068_v0  ;;  %839 = vmatprep.subr.bf16.mxu1 %v1068_v0  ;;  %v111_v3 = vld [vmem:[#allocation8 + $0x8] sm:$0xff]  ;;  %v112_v4 = vld [vmem:[#allocation8 + $0x10] sm:$0xff]  ;;  %v113_v6 = vld [vmem:[#allocation8 + $0x18] sm:$0xff]  ;;  %vm114_vm1 = vcmask 261120  }
  0x5c   :  { %764 = vmatprep.mubr.msk.f32.mxu0 %vm1069_vm0, %v1070_v1  ;;  %775 = vmatprep.mubr.msk.f32.mxu1 %vm1069_vm0, %v1070_v1  ;;  %v834_v5 = vpack.c.bf16 %v111_v3, %v110_v2  ;;  %v189_v7 = vld [vmem:[#allocation8 + $0x20] sm:$0xff]  ;;  %v190_v8 = vld [vmem:[#allocation8 + $0x28] sm:$0xff]  ;;  %v837_v10 = vpack.c.bf16 %v113_v6, %v112_v4  ;;  %v191_v11 = vld [vmem:[#allocation8 + $0x30] sm:$0xff] }
  0x5d   :  { %v840_v9 = vpack.c.bf16 %v190_v8, %v189_v7  ;;  %v192_v12 = vld [vmem:[#allocation8 + $0x38] sm:$0xff]  ;;  %v96_v13 = vld [vmem:[#allocation7] sm:$0xff]  ;;  %v97_v14 = vld [vmem:[#allocation7 + $0x8] sm:$0xff] }
  0x5e   :  { %835 = vmatpush3.bf16.msra.mxu0 %v834_v5  ;;  %v843_v15 = vpack.c.bf16 %v192_v12, %v191_v11  ;;  %v101_v16 = vld [vmem:[#allocation7 + $0x20] sm:$0xff]  ;;  %v102_v17 = vld [vmem:[#allocation7 + $0x28] sm:$0xff]  ;;  %v1195_v18 = vld [vmem:[#allocation5] sm:$0xff]  ;;  %v846_v19 = vpack.c.bf16 %v97_v14, %v96_v13 }
  0x5f   :  { %836 = vmatprep.subr.bf16.mxu0 %v1068_v0  ;;  %841 = vmatpush3.bf16.msra.mxu1 %v840_v9  ;;  %v98_v20 = vld [vmem:[#allocation7 + $0x10] sm:$0xff]  ;;  %v99_v21 = vld [vmem:[#allocation7 + $0x18] sm:$0xff]  ;;  %v852_v22 = vpack.c.bf16 %v102_v17, %v101_v16  ;;  %v106_v26 = vld [vmem:[#allocation7 + $0x40] sm:$0xff] }
  0x60   :  { %842 = vmatprep.subr.bf16.mxu1 %v1068_v0  ;;  %v103_v23 = vld [vmem:[#allocation7 + $0x30] sm:$0xff]  ;;  %v104_v24 = vld [vmem:[#allocation7 + $0x38] sm:$0xff]  ;;  %v849_v25 = vpack.c.bf16 %v99_v21, %v98_v20  ;;  %v107_v27 = vld [vmem:[#allocation7 + $0x48] sm:$0xff] }
  0x61   :  { %v855_v28 = vpack.c.bf16 %v104_v24, %v103_v23  ;;  %v264_v29 = vld [vmem:[#allocation8 + $0x40] sm:$0xff]  ;;  %v265_v30 = vld [vmem:[#allocation8 + $0x48] sm:$0xff]  ;;  %v94_v31 = vld [vmem:[#allocation2] sm:$0xff]  ;;  %v858_v32 = vpack.c.bf16 %v107_v27, %v106_v26 }
  0x62   :  { %838 = vmatpush3.bf16.msra.mxu0 %v837_v10  ;;  %v108_v33 = vld [vmem:[#allocation7 + $0x50] sm:$0xff]  ;;  %v109_v34 = vld [vmem:[#allocation7 + $0x58] sm:$0xff]  ;;  %v864_v35 = vpack.c.bf16 %v265_v30, %v264_v29  ;;  %v592_v40 = vld [vmem:[#allocation10] sm:$0xff] }
  0x63   :  { %845 = vmatprep.subr.bf16.mxu0 %v1068_v0  ;;  %844 = vmatpush3.bf16.msra.mxu1 %v843_v15  ;;  %v266_v36 = vld [vmem:[#allocation8 + $0x50] sm:$0xff]  ;;  %v267_v37 = vld [vmem:[#allocation8 + $0x58] sm:$0xff]  ;;  %v861_v38 = vpack.c.bf16 %v109_v34, %v108_v33  ;;  %v593_v41 = vld [vmem:[#allocation10 + $0x8] sm:$0xff] }
  0x64   :  { %851 = vmatprep.subr.bf16.mxu1 %v1068_v0  ;;  %v867_v39 = vpack.c.bf16 %v267_v37, %v266_v36  ;;  %v594_v42 = vld [vmem:[#allocation10 + $0x10] sm:$0xff]  ;;  %v870_v43 = vpack.c.bf16 %v593_v41, %v592_v40  ;;  %v595_v44 = vld [vmem:[#allocation10 + $0x18] sm:$0xff] }
  0x65   :  { %765 = vmatmul.mubr.msk.f32.vlgmr.msra.gmra.mrb[0].mxu0 %vm114_vm1, %v1195_v18  ;;  %v873_v45 = vpack.c.bf16 %v595_v44, %v594_v42  ;;  %v712_v50 = vld [vmem:[%s1273_s4] ss:$0 sm:$0xff]  ;;  %v714_v54 = vld [vmem:[%s1273_s4 + $0x1] ss:$0 sm:$0xff]  ;;  %v717_v7 = vld [vmem:[%s1273_s4 + $0x3] ss:$0 sm:$0xff] }
  0x66   :  { %847 = vmatpush3.bf16.msra.mxu0 %v846_v19  ;;  %776 = vmatmul.mubr.msk.f32.vlgmr.msra.gmra.mrb[0].mxu1 %vm114_vm1, %v1195_v18  ;;  %v715_v8 = vld [vmem:[%s1273_s4 + $0x2] ss:$0 sm:$0xff]  ;;  %s1071_s4 = smov [#allocation11]  }
  0x67   :  { %848 = vmatprep.subr.bf16.mxu0 %v1068_v0  ;;  %786 = vmatprep.mubr.msk.f32.mxu0 %vm1069_vm0, %v1070_v1  ;;  %s684_s25 = sshll.u32 %s1071_s4, 4  ;;  %s685_s25 = int_to_ptr.vmem [resolvable:$true] %s684_s25 }
  0x68   :  { %853 = vmatpush3.bf16.msra.mxu1 %v852_v22  ;;  %797 = vmatprep.mubr.msk.f32.mxu1 %vm1069_vm0, %v1070_v1  ;;  %s1007_s26 = scalar_lea.vmem %s685_s25, 128  ;;  %p1012_p13 = scmp.lt.s32.totalorder %s685_s25, %s685_s25 }
  0x69   :  { %854 = vmatprep.subr.bf16.mxu1 %v1068_v0  ;;  %p1008_p12 = scmp.ne.s32.totalorder %s685_s25, %s1007_s26  ;;  %p1013_p0 = scmp.lt.s32.totalorder %s1007_s26, %s1007_s26 }
  0x6a   :  { %850 = vmatpush3.bf16.msra.mxu0 %v849_v25 }
  0x6b   :  { %857 = vmatprep.subr.bf16.mxu0 %v1068_v0  ;;  %p1014_p1 = por %p1013_p0, %p1012_p13 }
  0x6c   :  { %856 = vmatpush3.bf16.msra.mxu1 %v855_v28 }
  0x6d   :  { %787 = vmatmul.mubr.msk.f32.vlgmr.msra.gmra.mrb[2].mxu0 %vm114_vm1, %v94_v31  ;;  %863 = vmatprep.subr.bf16.mxu1 %v1068_v0  ;;  %p1015_p2 = pnand %p1014_p1, %p1008_p12 }
  0x6e   :  { %859 = vmatpush3.bf16.msra.mxu0 %v858_v32  ;;  %808 = vmatprep.mubr.msk.f32.mxu0 %vm1069_vm0, %v1070_v1 }
  0x6f   :  { %798 = vmatmul.mubr.msk.f32.vlgmr.msra.gmra.mrb[2].mxu1 %vm114_vm1, %v94_v31  ;;  %860 = vmatprep.subr.bf16.mxu0 %v1068_v0 }
  0x70   :  { %865 = vmatpush3.bf16.msra.mxu1 %v864_v35  ;;  %819 = vmatprep.mubr.msk.f32.mxu1 %vm1069_vm0, %v1070_v1 }
  0x71   :  { %866 = vmatprep.subr.bf16.mxu1 %v1068_v0 }
  0x72   :  { %862 = vmatpush3.bf16.msra.mxu0 %v861_v38 }
  0x73   :  { %869 = vmatprep.subr.bf16.mxu0 %v1068_v0 }
  0x74   :  { %868 = vmatpush3.bf16.msra.mxu1 %v867_v39 }
  0x75   :  { %809 = vmatmul.mubr.msk.f32.vlgmr.msra.gmra.mrb[4].mxu0 %vm114_vm1, %v94_v31 }
  0x76   :  { %830 = vmatprep.mubr.msk.f32.mxu0 %vm1069_vm0, %v1070_v1  ;;  %871 = vmatpush3.bf16.msra.mxu0 %v870_v43 }
  0x77   :  { %820 = vmatmul.mubr.msk.f32.vlgmr.msra.gmra.mrb[4].mxu1 %vm114_vm1, %v1195_v18  ;;  %872 = vmatprep.subr.bf16.mxu0 %v1068_v0 }
  0x7a   :  { %874 = vmatpush3.bf16.msra.mxu0 %v873_v45 }
 0x138   :  { %v184_v46 = vpop.f32.mrb[0].mxu0 }
 0x139   :  { %v766_v47 = vpop.f32.mrb[1].mxu0  ;;  %v259_v48 = vpop.f32.mrb[0].mxu1 }
 0x13a   :  { %v777_v49 = vpop.f32.mrb[1].mxu1 }
 0x140   :  { %v341_v51 = vpop.f32.mrb[2].mxu0 }
 0x141   :  { %v342_v52 = vadd.f32 %v341_v51, %v184_v46  ;;  %v788_v53 = vpop.f32.mrb[3].mxu0 }
 0x142   :  { %v422_v55 = vpop.f32.mrb[2].mxu1 }
 0x143   :  { %v349_v56 = vadd.f32 %v712_v50, %v342_v52  ;;  %v423_v57 = vadd.f32 %v422_v55, %v259_v48  ;;  %v799_v58 = vpop.f32.mrb[3].mxu1 }
 0x145   :  { %v350_v59 = vsub.f32 0.0, %v349_v56  ;;  %v430_v60 = vadd.f32 %v714_v54, %v423_v57 }
 0x147   :  { %v351_v61 = vmul.f32 1.442695, %v350_v59  ;;  %v431_v62 = vsub.f32 0.0, %v430_v60 }
 0x148   :  { %v507_v63 = vpop.f32.mrb[4].mxu0 }
 0x149   :  { %887 = vpow2.f32 %v351_v61  ;;  %v810_v0 = vpop.f32.mrb[5].mxu0  ;;  %v432_v3 = vmul.f32 1.442695, %v431_v62  ;;  %v508_v11 = vadd.f32 %v715_v8, %v507_v63 }
 0x14a   :  { %v581_v1 = vpop.f32.mrb[4].mxu1 }
 0x14b   :  { %v821_v2 = vpop.f32.mrb[5].mxu1  ;;  %889 = vpow2.f32 %v432_v3  ;;  %v582_v10 = vadd.f32 %v717_v7, %v581_v1 }
 0x153   :  { %v888_v4 = vpop.eup %887 }
 0x154   :  { %v353_v5 = vadd.f32 1.0, %v888_v4 }
 0x155   :  { %v890_v6 = vpop.eup %889 }
 0x156   :  { %891 = vrcp.f32 %v353_v5  ;;  %v434_v9 = vadd.f32 1.0, %v890_v6 }
 0x158   :  { %893 = vrcp.f32 %v434_v9 }
 0x160   :  { %v892_v12 = vpop.eup %891 }
 0x161   :  { %v585_v13 = vmul.f32 %v892_v12, %v582_v10 }
 0x162   :  { %v894_v15 = vpop.eup %893 }
 0x163   :  { %v586_v14 = vadd.f32 %v585_v13, %v508_v11  ;;  %v588_v16 = vsub.f32 1.0, %v894_v15  ;;  %v590_v20 = vmul.f32 %v894_v15, %v1195_v18 }
 0x165   :  { %895 = vtanh.f32 %v586_v14 }
 0x16f   :  { %v896_v17 = vpop.eup %895 }
 0x170   :  { %v589_v19 = vmul.f32 %v896_v17, %v588_v16 }
 0x172   :  { %v591_v21 = vadd.f32 %v590_v20, %v589_v19 }
 0x174   :  { %831 = vmatmul.mubr.msk.f32.vlgmr.msra.gmra.mrb[6].mxu0 %vm114_vm1, %v591_v21  ;;  %676 = vst.msk [vmem:[#allocation11] sm:$0xff] %vm114_vm1, %v591_v21 }
 0x175   :  { %1018 = shalt.err (!%p1015_p2)
}
 0x176   :  { %s1019_s30 = scalar_lea.hbm %s1276_s7, 128 }
 0x177   :  { %p1020_p3 = scmp.ne.s32.totalorder %s1276_s7, %s1019_s30  ;;  %p1023_p4 = scmp.lt.u32.totalorder %s1019_s30, %s1276_s7 }
 0x179   :  { %p1025_p5 = pnand %p1023_p4, %p1020_p3 }
 0x17b   :  { %1028 = shalt.err (!%p1025_p5)
}
 0x17c   :  { %687 = dma.vmem_to_hbm [thread:$0]  %s685_s25, 128, %s1276_s7, [#allocation4]   ;;  %v719_v18 = vld [vmem:[%s1275_s6] ss:$0 sm:$0xff] }
 0x17d   :  { %s1072_s15 = smov [#allocation12]  }
 0x17e   :  { %s694_s16 = sshll.u32 %s1072_s15, 4  ;;  %s695_s16 = int_to_ptr.vmem [resolvable:$true] %s694_s16 }
 0x17f   :  { %s1029_s17 = scalar_lea.vmem %s695_s16, 128  ;;  %p1034_p7 = scmp.lt.s32.totalorder %s695_s16, %s695_s16 }
 0x180   :  { %p1030_p6 = scmp.ne.s32.totalorder %s695_s16, %s1029_s17  ;;  %p1035_p8 = scmp.lt.s32.totalorder %s1029_s17, %s1029_s17 }
 0x182   :  { %p1036_p9 = por %p1035_p8, %p1034_p7 }
 0x184   :  { %p1037_p10 = pnand %p1036_p9, %p1030_p6 }
 0x247   :  { %v672_v22 = vpop.f32.mrb[6].mxu0 }
 0x248   :  { %v673_v23 = vadd.f32 %v719_v18, %v672_v22  ;;  %v832_v24 = vpop.f32.mrb[7].mxu0 }
 0x24a   :  { %677 = vst.msk [vmem:[#allocation12] sm:$0xff] %vm114_vm1, %v673_v23 }
 0x24b   :  { %1040 = shalt.err (!%p1037_p10)
}
 0x24c   :  { %s1041_s2 = scalar_lea.hbm %s1277_s8, 128 }
 0x24d   :  { %p1042_p11 = scmp.ne.s32.totalorder %s1277_s8, %s1041_s2  ;;  %p1045_p12 = scmp.lt.u32.totalorder %s1041_s2, %s1277_s8 }
 0x24f   :  { %p1047_p13 = pnand %p1045_p12, %p1042_p11 }
 0x251   :  { %1050 = shalt.err (!%p1047_p13)
}
 0x252   :  { %697 = dma.vmem_to_hbm [thread:$0]  %s695_s16, 128, %s1277_s8, [#allocation13]  }
 0x253   :  { %1057 = dma.done.wait [#allocation4], 128  }
 0x254   :  { %1058 = vsyncadd [#allocation4], 4294967168 }
 0x255   :  { %1059 = dma.done.wait [#allocation13], 128  }
 0x256   :  { %1060 = vsyncadd [#allocation13], 4294967168 }
 0x257   :  { %704 = vsyncpa [#allocation3], 1 }
 0x258   :  { %705 = vsyncpa [#allocation6], 1 }
 0x259   :  { %706 = vsyncpa [#allocation9], 1 }
 0x25a   :  { %707 = vsyncpa [#allocation4], 1 }
 0x25b   :  { %708 = vsyncpa [#allocation13], 1 }

</bundles_post_ra>
